<compile_context>
chip_gen: v7x
topology: tpu7x:2x2x1
jax: 0.10.0
libtpu: 0.0.40
codegen_flags: <defaults>
</compile_context>

<pallas_src>
import functools

import jax
import jax.numpy as jnp
from jax.experimental import pallas as pl
from jax.experimental.pallas import tpu as pltpu

# ----------------------------------------------------------------------------
# Synthetic ObsSpaceUnit layout.
# ----------------------------------------------------------------------------
POWER_DIM_START = 0
ICE_DIM_START = 1
ORE_DIM_START = 2
IS_IN_TARGET = 3
IS_AT_HOME = 4
TARGET_FACTORY_POS_START = 5   # occupies cols 5, 6
TARGET_POS_START = 7           # occupies cols 7, 8
TASK_TYPE_START = 9
TRANSFERED_START = 10

SIMPLE_IDX = (
    POWER_DIM_START, ICE_DIM_START, ORE_DIM_START, IS_IN_TARGET, IS_AT_HOME,
    TARGET_FACTORY_POS_START, TARGET_FACTORY_POS_START + 1,
    TARGET_POS_START, TARGET_POS_START + 1,
    TASK_TYPE_START, TRANSFERED_START,
)  # 11 columns


def _round_up(n, m):
    return ((n + m - 1) // m) * m


# ----------------------------------------------------------------------------
# Pallas kernel: fused preprocessing + simple_net + deep_net (batch-on-lanes).
# ----------------------------------------------------------------------------
def _cri_mlp_kernel(xt_ref, inv_normer_ref, mask_tf_ref, mask_tp_ref,
                    w1t_ref, b1_ref, w2t_ref, wsct_ref, bias_ref, out_ref):
    # x^T tile (D, TB): batch on the lane axis -> fully lane-dense VPU/EUP work.
    # obs normalization: x / normer == x * (1/normer)  (precomputed inverse).
    xt = xt_ref[...].astype(jnp.float32) * inv_normer_ref[...]            # (D, TB)

    # Per-column L1 renorm of the two position pairs: direct sublane-row reads,
    # no masks for the reduction and no cross-lane XLU reduces.
    tf, tp = TARGET_FACTORY_POS_START, TARGET_POS_START
    ntf = jnp.abs(xt[tf:tf + 1, :]) + jnp.abs(xt[tf + 1:tf + 2, :]) + 1.0  # (1, TB)
    ntp = jnp.abs(xt[tp:tp + 1, :]) + jnp.abs(xt[tp + 1:tp + 2, :]) + 1.0  # (1, TB)
    inv_tf = 1.0 / ntf   # exact (review: approx reciprocal deviated from ref)
    inv_tp = 1.0 / ntp
    # Scatter the two scales back onto rows {tf,tf+1}/{tp,tp+1} via 0/1 column
    # masks (D, 1); all lane-dense elementwise, no row updates needed.
    scale = (1.0 + mask_tf_ref[...] * (inv_tf - 1.0)
                 + mask_tp_ref[...] * (inv_tp - 1.0))                      # (D, TB)
    xt = xt * scale                                                        # preprocessed

    # deep_net: h^T = tanh(W1^T @ x^T + b1)  -> (H, TB), lane-dense tanh (EUP).
    ht = jnp.tanh(
        jnp.dot(w1t_ref[...], xt, preferred_element_type=jnp.float32)
        + b1_ref[...])                                                     # (H, TB)

    # Value head: simple_net (11-col gather folded into a scattered (1, D)
    # weight) + deep_net output layer; biases pre-folded.  Lane-dense store.
    out_ref[...] = (
        jnp.dot(wsct_ref[...], xt, preferred_element_type=jnp.float32)
        + jnp.dot(w2t_ref[...], ht, preferred_element_type=jnp.float32)
        + bias_ref[...])                                                   # (1, TB)


# ----------------------------------------------------------------------------
# Wrapper: batch(lane)-tiled pallas_call.
# ----------------------------------------------------------------------------
def _pick_tile(b, max_tb):
    """Few, large, balanced lane tiles (multiples of 128)."""
    b128 = _round_up(max(b, 1), 128)
    if b128 <= 1024:
        return b128, 1                       # one step: per-step overhead dominates
    n = max(2, -(-b128 // max_tb))           # >=2 steps so both v7x TCs get work
    tb = _round_up(-(-b128 // n), 128)
    n = -(-b128 // tb)
    return tb, n


@functools.partial(jax.jit, static_argnames=("max_tb",))
def cri_mlp_forward(x, params, *, max_tb=4096):
    """CriMLPNetwork.forward: x (B, D) -> state value (B, 1) float32."""
    B, D = x.shape
    H = params["w1t"].shape[0]

    TB, n_steps = _pick_tile(B, max_tb)
    B_pad = TB * n_steps

    # Batch-on-lanes: feed x^T (D, B_pad).  Single transpose+zero-pad
    # materialization (fused by XLA); a production obs pipeline would emit x^T
    # directly and skip this pass.
    xt = jnp.pad(x.T, ((0, 0), (0, B_pad - B)))

    tile = lambda i: (0, i)     # per-grid-step batch tile (lane axis)
    full = lambda i: (0, 0)     # VMEM-resident across grid steps

    cost = pl.CostEstimate(
        flops=2 * B_pad * (D * H + D + H),
        transcendentals=B_pad * H,
        bytes_accessed=B_pad * D * x.dtype.itemsize + B_pad * 4
                       + (D * H + D + 2 * H + 3) * 4)

    out = pl.pallas_call(
        _cri_mlp_kernel,
        out_shape=jax.ShapeDtypeStruct((1, B_pad), jnp.float32),
        grid=(n_steps,),
        in_specs=[
            pl.BlockSpec((D, TB), tile),   # x^T (bf16, double-buffered)
            pl.BlockSpec((D, 1), full),    # 1/normer column
            pl.BlockSpec((D, 1), full),    # mask column: target_factory_pos rows
            pl.BlockSpec((D, 1), full),    # mask column: target_pos rows
            pl.BlockSpec((H, D), full),    # deep_net W1^T
            pl.BlockSpec((H, 1), full),    # deep_net b1 column
            pl.BlockSpec((1, H), full),    # deep_net W2^T
            pl.BlockSpec((1, D), full),    # simple_net W scattered to D cols, transposed
            pl.BlockSpec((1, 1), full),    # folded bias (b2 + bsc)
        ],
        out_specs=pl.BlockSpec((1, TB), tile),
        compiler_params=pltpu.CompilerParams(
            dimension_semantics=("parallel",)),   # megacore sharding on v7x
        cost_estimate=cost,
    )(xt, params["inv_normer_col"], params["mask_tf_col"], params["mask_tp_col"],
      params["w1t"], params["b1_col"], params["w2t"], params["wsct"],
      params["bias_folded"])
    return out[0, :B].reshape(B, 1)


# ----------------------------------------------------------------------------
# Deterministic parameter construction (synthetic init; no checkpoint loading).
# ----------------------------------------------------------------------------
def make_params(key, state_dim, hidden_dim=64):
    def linear(k, fan_in, fan_out):
        k1, k2 = jax.random.split(k)
        bound = 1.0 / jnp.sqrt(fan_in)
        w = jax.random.uniform(k1, (fan_in, fan_out), jnp.float32, -bound, bound)
        b = jax.random.uniform(k2, (1, fan_out), jnp.float32, -bound, bound)
        return w, b

    k1, k2, k3 = jax.random.split(key, 3)
    w1, b1 = linear(k1, state_dim, hidden_dim)      # deep_net Linear(D, H)
    w2, b2 = linear(k2, hidden_dim, 1)              # deep_net Linear(H, 1)
    wsc_11, bsc = linear(k3, 11, 1)                 # simple_net Linear(11, 1)

    # Fold the 11-column gather into a scattered (D,) weight (exact equivalence).
    wsc_full = jnp.zeros((state_dim,), jnp.float32).at[
        jnp.array(SIMPLE_IDX)].set(wsc_11[:, 0])

    # Observation normalizer (ObsSpaceUnit.normer): deterministic positive vector.
    normer = jnp.linspace(1.0, 2.0, state_dim, dtype=jnp.float32).reshape(1, -1)

    mask_tf = jnp.zeros((state_dim,), jnp.float32).at[
        jnp.array([TARGET_FACTORY_POS_START, TARGET_FACTORY_POS_START + 1])].set(1.0)
    mask_tp = jnp.zeros((state_dim,), jnp.float32).at[
        jnp.array([TARGET_POS_START, TARGET_POS_START + 1])].set(1.0)

    # NOTE: p_d (3,) and scales (5,) exist in __init__ but are unused in forward().
    return dict(
        # kernel-side, batch-on-lanes (transposed / precomputed / folded) params
        inv_normer_col=(1.0 / normer).reshape(-1, 1),
        mask_tf_col=mask_tf.reshape(-1, 1),
        mask_tp_col=mask_tp.reshape(-1, 1),
        w1t=w1.T, b1_col=b1.reshape(-1, 1), w2t=w2.T,
        wsct=wsc_full.reshape(1, -1), bias_folded=b2 + bsc,
        # reference-side raw parameters
        normer=normer, w1=w1, b1=b1, w2=w2, b2=b2, wsc_11=wsc_11, bsc=bsc,
    )


def reference_forward(x_f32, p):
    """Pure-JAX mirror of CriMLPNetwork.forward (f32, exact divides)."""
    hp = jax.lax.Precision.HIGHEST
    tf, tp = TARGET_FACTORY_POS_START, TARGET_POS_START
    x = x_f32 / p["normer"]
    ntf = jnp.abs(x[:, tf:tf + 1]) + jnp.abs(x[:, tf + 1:tf + 2]) + 1.0
    ntp = jnp.abs(x[:, tp:tp + 1]) + jnp.abs(x[:, tp + 1:tp + 2]) + 1.0
    x = x.at[:, tf:tf + 2].set(x[:, tf:tf + 2] / ntf)
    x = x.at[:, tp:tp + 2].set(x[:, tp:tp + 2] / ntp)
    simple_in = x[:, jnp.array(SIMPLE_IDX)]
    deep = (jnp.dot(jnp.tanh(jnp.dot(x, p["w1"], precision=hp) + p["b1"]),
                    p["w2"], precision=hp) + p["b2"])
    return jnp.dot(simple_in, p["wsc_11"], precision=hp) + p["bsc"] + deep


if __name__ == "__main__":
    D, H = 32, 64

    root = jax.random.PRNGKey(0)
    k_param, k_x1, k_x2 = jax.random.split(root, 3)
    params = make_params(k_param, D, H)

    # Two cases: tiny batch (single grid step) and a batch large enough to
    # exercise the multi-step, balanced (2-TC-friendly) tiled grid.
    for name, B, kx in (("small", 2, k_x1), ("tiled", 1056, k_x2)):
        # Observations stored bf16 in HBM (halves the dominant read traffic).
        x = (jax.random.normal(kx, (B, D), jnp.float32) * 3.0).astype(jnp.bfloat16)

        val = cri_mlp_forward(x, params)
        jax.block_until_ready(val)

        ref = reference_forward(x.astype(jnp.float32), params)
        assert val.shape == (B, 1), val.shape
        assert bool(jnp.all(jnp.isfinite(val)))
        err = float(jnp.max(jnp.abs(val - ref)))
        assert bool(jnp.allclose(val, ref, rtol=5e-3, atol=5e-3)), (name, err)

    print("KERNEL_OK")
</pallas_src>

<mosaic_0001>
module attributes {stable_mosaic.version = 11 : i64} {
  func.func @_cri_mlp_kernel(%arg0: i32, %arg1: memref<32x128xbf16, #tpu.memory_space<vmem>>, %arg2: memref<32x1xf32, #tpu.memory_space<vmem>>, %arg3: memref<32x1xf32, #tpu.memory_space<vmem>>, %arg4: memref<32x1xf32, #tpu.memory_space<vmem>>, %arg5: memref<64x32xf32, #tpu.memory_space<vmem>>, %arg6: memref<64x1xf32, #tpu.memory_space<vmem>>, %arg7: memref<1x64xf32, #tpu.memory_space<vmem>>, %arg8: memref<1x32xf32, #tpu.memory_space<vmem>>, %arg9: memref<1x1xf32, #tpu.memory_space<vmem>>, %arg10: memref<1x128xf32, #tpu.memory_space<vmem>>) attributes {dimension_semantics = [#tpu.dimension_semantics<parallel>], iteration_bounds = array<i64: 1>, scalar_prefetch = 0 : i64, scratch_operands = 0 : i64, tpu.core_type = #tpu.core_type<tc>, window_params = [{transform_indices = @transform_0, window_bounds = array<i64: 32, 128>}, {pipeline_mode = #tpu.pipeline_mode<synchronous>, transform_indices = @transform_1, window_bounds = array<i64: 32, 1>}, {pipeline_mode = #tpu.pipeline_mode<synchronous>, transform_indices = @transform_2, window_bounds = array<i64: 32, 1>}, {pipeline_mode = #tpu.pipeline_mode<synchronous>, transform_indices = @transform_3, window_bounds = array<i64: 32, 1>}, {pipeline_mode = #tpu.pipeline_mode<synchronous>, transform_indices = @transform_4, window_bounds = array<i64: 64, 32>}, {pipeline_mode = #tpu.pipeline_mode<synchronous>, transform_indices = @transform_5, window_bounds = array<i64: 64, 1>}, {pipeline_mode = #tpu.pipeline_mode<synchronous>, transform_indices = @transform_6, window_bounds = array<i64: 1, 64>}, {pipeline_mode = #tpu.pipeline_mode<synchronous>, transform_indices = @transform_7, window_bounds = array<i64: 1, 32>}, {pipeline_mode = #tpu.pipeline_mode<synchronous>, transform_indices = @transform_8, window_bounds = array<i64: 1, 1>}, {transform_indices = @transform_9, window_bounds = array<i64: 1, 128>}]} {
    %c0 = arith.constant 0 : index
    %c0_0 = arith.constant 0 : index
    %0 = vector.load %arg1[%c0, %c0_0] : memref<32x128xbf16, #tpu.memory_space<vmem>>, vector<32x128xbf16>
    %1 = arith.extf %0 : vector<32x128xbf16> to vector<32x128xf32>
    %c0_1 = arith.constant 0 : index
    %c0_2 = arith.constant 0 : index
    %2 = vector.load %arg2[%c0_1, %c0_2] : memref<32x1xf32, #tpu.memory_space<vmem>>, vector<32x1xf32>
    %3 = vector.broadcast %2 : vector<32x1xf32> to vector<32x128xf32>
    %4 = arith.mulf %1, %3 : vector<32x128xf32>
    %5 = vector.extract_strided_slice %4 {offsets = [5, 0], sizes = [1, 128], strides = [1, 1]} : vector<32x128xf32> to vector<1x128xf32>
    %6 = math.absf %5 : vector<1x128xf32>
    %7 = vector.extract_strided_slice %4 {offsets = [6, 0], sizes = [1, 128], strides = [1, 1]} : vector<32x128xf32> to vector<1x128xf32>
    %8 = math.absf %7 : vector<1x128xf32>
    %9 = arith.addf %6, %8 : vector<1x128xf32>
    %cst = arith.constant 1.000000e+00 : f32
    %10 = vector.broadcast %cst : f32 to vector<1x128xf32>
    %11 = arith.addf %9, %10 : vector<1x128xf32>
    %12 = vector.extract_strided_slice %4 {offsets = [7, 0], sizes = [1, 128], strides = [1, 1]} : vector<32x128xf32> to vector<1x128xf32>
    %13 = math.absf %12 : vector<1x128xf32>
    %14 = vector.extract_strided_slice %4 {offsets = [8, 0], sizes = [1, 128], strides = [1, 1]} : vector<32x128xf32> to vector<1x128xf32>
    %15 = math.absf %14 : vector<1x128xf32>
    %16 = arith.addf %13, %15 : vector<1x128xf32>
    %cst_3 = arith.constant 1.000000e+00 : f32
    %17 = vector.broadcast %cst_3 : f32 to vector<1x128xf32>
    %18 = arith.addf %16, %17 : vector<1x128xf32>
    %cst_4 = arith.constant 1.000000e+00 : f32
    %19 = vector.broadcast %cst_4 : f32 to vector<1x128xf32>
    %20 = arith.divf %19, %11 : vector<1x128xf32>
    %cst_5 = arith.constant 1.000000e+00 : f32
    %21 = vector.broadcast %cst_5 : f32 to vector<1x128xf32>
    %22 = arith.divf %21, %18 : vector<1x128xf32>
    %c0_6 = arith.constant 0 : index
    %c0_7 = arith.constant 0 : index
    %23 = vector.load %arg3[%c0_6, %c0_7] : memref<32x1xf32, #tpu.memory_space<vmem>>, vector<32x1xf32>
    %cst_8 = arith.constant 1.000000e+00 : f32
    %24 = vector.broadcast %cst_8 : f32 to vector<1x128xf32>
    %25 = arith.subf %20, %24 : vector<1x128xf32>
    %26 = vector.broadcast %23 : vector<32x1xf32> to vector<32x128xf32>
    %27 = vector.broadcast %25 : vector<1x128xf32> to vector<32x128xf32>
    %28 = arith.mulf %26, %27 : vector<32x128xf32>
    %cst_9 = arith.constant 1.000000e+00 : f32
    %29 = vector.broadcast %cst_9 : f32 to vector<32x128xf32>
    %30 = arith.addf %29, %28 : vector<32x128xf32>
    %c0_10 = arith.constant 0 : index
    %c0_11 = arith.constant 0 : index
    %31 = vector.load %arg4[%c0_10, %c0_11] : memref<32x1xf32, #tpu.memory_space<vmem>>, vector<32x1xf32>
    %cst_12 = arith.constant 1.000000e+00 : f32
    %32 = vector.broadcast %cst_12 : f32 to vector<1x128xf32>
    %33 = arith.subf %22, %32 : vector<1x128xf32>
    %34 = vector.broadcast %31 : vector<32x1xf32> to vector<32x128xf32>
    %35 = vector.broadcast %33 : vector<1x128xf32> to vector<32x128xf32>
    %36 = arith.mulf %34, %35 : vector<32x128xf32>
    %37 = arith.addf %30, %36 : vector<32x128xf32>
    %38 = arith.mulf %4, %37 : vector<32x128xf32>
    %c0_13 = arith.constant 0 : index
    %c0_14 = arith.constant 0 : index
    %39 = vector.load %arg5[%c0_13, %c0_14] : memref<64x32xf32, #tpu.memory_space<vmem>>, vector<64x32xf32>
    %cst_15 = arith.constant dense<0.000000e+00> : vector<64x128xf32>
    %40 = tpu.matmul %39, %38, %cst_15 {dimension_numbers = #tpu.dot_dimension_numbers<[1], [0], [0], [1], [0, 0, 1, 1], [], []>} : vector<64x32xf32>, vector<32x128xf32>, vector<64x128xf32> -> vector<64x128xf32>
    %c0_16 = arith.constant 0 : index
    %c0_17 = arith.constant 0 : index
    %41 = vector.load %arg6[%c0_16, %c0_17] : memref<64x1xf32, #tpu.memory_space<vmem>>, vector<64x1xf32>
    %42 = vector.broadcast %41 : vector<64x1xf32> to vector<64x128xf32>
    %43 = arith.addf %40, %42 : vector<64x128xf32>
    %44 = math.tanh %43 : vector<64x128xf32>
    %c0_18 = arith.constant 0 : index
    %c0_19 = arith.constant 0 : index
    %45 = vector.load %arg8[%c0_18, %c0_19] : memref<1x32xf32, #tpu.memory_space<vmem>>, vector<1x32xf32>
    %cst_20 = arith.constant dense<0.000000e+00> : vector<1x128xf32>
    %46 = tpu.matmul %45, %38, %cst_20 {dimension_numbers = #tpu.dot_dimension_numbers<[1], [0], [0], [1], [0, 0, 1, 1], [], []>} : vector<1x32xf32>, vector<32x128xf32>, vector<1x128xf32> -> vector<1x128xf32>
    %c0_21 = arith.constant 0 : index
    %c0_22 = arith.constant 0 : index
    %47 = vector.load %arg7[%c0_21, %c0_22] : memref<1x64xf32, #tpu.memory_space<vmem>>, vector<1x64xf32>
    %cst_23 = arith.constant dense<0.000000e+00> : vector<1x128xf32>
    %48 = tpu.matmul %47, %44, %cst_23 {dimension_numbers = #tpu.dot_dimension_numbers<[1], [0], [0], [1], [0, 0, 1, 1], [], []>} : vector<1x64xf32>, vector<64x128xf32>, vector<1x128xf32> -> vector<1x128xf32>
    %49 = arith.addf %46, %48 : vector<1x128xf32>
    %c0_24 = arith.constant 0 : index
    %c0_25 = arith.constant 0 : index
    %50 = vector.load %arg9[%c0_24, %c0_25] : memref<1x1xf32, #tpu.memory_space<vmem>>, vector<1x1xf32>
    %51 = vector.broadcast %50 : vector<1x1xf32> to vector<1x128xf32>
    %52 = arith.addf %49, %51 : vector<1x128xf32>
    %c0_26 = arith.constant 0 : index
    %c0_27 = arith.constant 0 : index
    %53 = vector.load %arg10[%c0_26, %c0_27] : memref<1x128xf32, #tpu.memory_space<vmem>>, vector<1x128xf32>
    tpu.vector_store %arg10[%c0_26, %c0_27], %52 {strides = array<i32>} : memref<1x128xf32, #tpu.memory_space<vmem>>, vector<1x128xf32>,
    return
  }
  func.func @transform_0(%arg0: i32) -> (i32, i32) {
    %c0_i32 = arith.constant 0 : i32
    %c0_i32_0 = arith.constant 0 : i32
    return %c0_i32, %arg0 : i32, i32
  }
  func.func @transform_1(%arg0: i32) -> (i32, i32) {
    %c0_i32 = arith.constant 0 : i32
    %c0_i32_0 = arith.constant 0 : i32
    %c0_i32_1 = arith.constant 0 : i32
    return %c0_i32, %c0_i32_0 : i32, i32
  }
  func.func @transform_2(%arg0: i32) -> (i32, i32) {
    %c0_i32 = arith.constant 0 : i32
    %c0_i32_0 = arith.constant 0 : i32
    %c0_i32_1 = arith.constant 0 : i32
    return %c0_i32, %c0_i32_0 : i32, i32
  }
  func.func @transform_3(%arg0: i32) -> (i32, i32) {
    %c0_i32 = arith.constant 0 : i32
    %c0_i32_0 = arith.constant 0 : i32
    %c0_i32_1 = arith.constant 0 : i32
    return %c0_i32, %c0_i32_0 : i32, i32
  }
  func.func @transform_4(%arg0: i32) -> (i32, i32) {
    %c0_i32 = arith.constant 0 : i32
    %c0_i32_0 = arith.constant 0 : i32
    %c0_i32_1 = arith.constant 0 : i32
    return %c0_i32, %c0_i32_0 : i32, i32
  }
  func.func @transform_5(%arg0: i32) -> (i32, i32) {
    %c0_i32 = arith.constant 0 : i32
    %c0_i32_0 = arith.constant 0 : i32
    %c0_i32_1 = arith.constant 0 : i32
    return %c0_i32, %c0_i32_0 : i32, i32
  }
  func.func @transform_6(%arg0: i32) -> (i32, i32) {
    %c0_i32 = arith.constant 0 : i32
    %c0_i32_0 = arith.constant 0 : i32
    %c0_i32_1 = arith.constant 0 : i32
    return %c0_i32, %c0_i32_0 : i32, i32
  }
  func.func @transform_7(%arg0: i32) -> (i32, i32) {
    %c0_i32 = arith.constant 0 : i32
    %c0_i32_0 = arith.constant 0 : i32
    %c0_i32_1 = arith.constant 0 : i32
    return %c0_i32, %c0_i32_0 : i32, i32
  }
  func.func @transform_8(%arg0: i32) -> (i32, i32) {
    %c0_i32 = arith.constant 0 : i32
    %c0_i32_0 = arith.constant 0 : i32
    %c0_i32_1 = arith.constant 0 : i32
    return %c0_i32, %c0_i32_0 : i32, i32
  }
  func.func @transform_9(%arg0: i32) -> (i32, i32) {
    %c0_i32 = arith.constant 0 : i32
    %c0_i32_0 = arith.constant 0 : i32
    return %c0_i32, %arg0 : i32, i32
  }
}

</mosaic_0001>

<bundles_post_ra>
// kernel: cri_mlp_forward.1
= control target key start
LH: loop header
LB: loop body
LE: loop exit
PB: predicated region body
PF: predicated region fallthrough
CT: control target
= control target key end

     0   :  { %v672_v0 = vmov 0   ;;  %vm220_vm0 = vcmask 261120   ;;  %v673_v24 = vmov 0.0|0.0   ;;  %v111_v43 = vlaneseq  ;;  %s848_s2 = inlined_call_operand.vmem [shape: f32[32,1], index: 2, kind: input, shape index: {}]   ;;  %s849_s1 = inlined_call_operand.vmem [shape: f32[32,1], index: 1, kind: input, shape index: {}]   ;;  %s850_s8 = inlined_call_operand.<no memory space> [shape: f32[1,1], index: 8, kind: input, shape index: {}]   ;;  %s851_s3 = inlined_call_operand.vmem [shape: f32[32,1], index: 3, kind: input, shape index: {}]   ;;  %s852_s5 = inlined_call_operand.vmem [shape: f32[64,1], index: 5, kind: input, shape index: {}]   ;;  %s853_s4 = inlined_call_operand.vmem [shape: f32[64,32], index: 4, kind: input, shape index: {}]   ;;  %s854_s0 = inlined_call_operand.vmem [shape: bf16[32,128], index: 0, kind: input, shape index: {}]   ;;  %s855_s7 = inlined_call_operand.vmem [shape: f32[1,32], index: 7, kind: input, shape index: {}]   ;;  %s856_s6 = inlined_call_operand.vmem [shape: f32[1,64], index: 6, kind: input, shape index: {}]   ;;  %s857_s9 = inlined_call_operand.vmem [shape: f32[1,128], index: 9, kind: output, shape index: {}]  }
   0x1   :  { %651 = vset.pattern.permute.xlu1 %v672_v0  ;;  %650 = vset.pattern.permute.xlu0 %v672_v0  ;;  %v86_v1 = vld [vmem:[%s848_s2] sm:$0xff]  ;;  %v14_v3 = vstv %s850_s8  ;;  %v87_v4 = vld [vmem:[%s848_s2 + $0x8] sm:$0xff]  ;;  %v89_v8 = vld [vmem:[%s848_s2 + $0x18] sm:$0xff]  ;;  %vm674_vm1 = vmmov 0   ;;  %vm360_vm2 = vcmask 523264  }
   0x2   :  { %v42_v2 = vld [vmem:[%s849_s1] sm:$0xff]  ;;  %93 = vperm.xlu1 %651, %v86_v1   ;;  %15 = vst [vmem:[#allocation2] sm:$0x1] %v14_v3  ;;  %v43_v5 = vld [vmem:[%s849_s1 + $0x8] sm:$0xff]  ;;  %v88_v9 = vld [vmem:[%s848_s2 + $0x10] sm:$0xff]  ;;  %628 = vmatprep.subr.bf16.mxu1 %v673_v24  ;;  %v797_v45 = vshrl.u32 %v111_v43, 7 }
   0x3   :  { %48 = vperm.xlu0 %650, %v42_v2   ;;  %v124_v6 = vld [vmem:[%s851_s3 + $0x8] sm:$0xff]  ;;  %v123_v7 = vld [vmem:[%s851_s3] sm:$0xff]  ;;  %v126_v10 = vld [vmem:[%s851_s3 + $0x18] sm:$0xff] }
   0x4   :  { %v125_v11 = vld [vmem:[%s851_s3 + $0x10] sm:$0xff]  ;;  %v45_v12 = vld [vmem:[%s849_s1 + $0x18] sm:$0xff]  ;;  %v173_v14 = vld [vmem:[%s852_s5 + $0x8] sm:$0xff]  ;;  %v113_v48 = vsub.s32 5, %v797_v45  ;;  %v150_v54 = vsub.s32 7, %v797_v45 }
   0x5   :  { %v44_v13 = vld [vmem:[%s849_s1 + $0x10] sm:$0xff]  ;;  %v172_v15 = vld [vmem:[%s852_s5] sm:$0xff]  ;;  %v175_v16 = vld [vmem:[%s852_s5 + $0x18] sm:$0xff] }
   0x6   :  { %98 = vperm.xlu1 %651, %v87_v4   ;;  %v174_v17 = vld [vmem:[%s852_s5 + $0x10] sm:$0xff]  ;;  %v177_v18 = vld [vmem:[%s852_s5 + $0x28] sm:$0xff]  ;;  %v176_v19 = vld [vmem:[%s852_s5 + $0x20] sm:$0xff] }
   0x7   :  { %53 = vperm.xlu0 %650, %v43_v5   ;;  %v179_v20 = vld [vmem:[%s852_s5 + $0x38] sm:$0xff]  ;;  %v178_v21 = vld [vmem:[%s852_s5 + $0x30] sm:$0xff]  ;;  %v164_v23 = vld [vmem:[%s853_s4] sm:$0xff] }
   0x8   :  { %578 = vmatprep.mubr.msk.f32.mxu0 %vm220_vm0, %v164_v23  ;;  %v536_v25 = vld [vmem:[%s854_s0] sm:$0xff]   ;;  %v543_v55 = vld [vmem:[%s854_s0 + $0x8] sm:$0xff]  }
   0x9   :  { %v507_v22 = vld [vmem:[#allocation2] sm:$0x1]  ;;  %v537_v26 = vunpack.c.l.bf16 %v536_v25  ;;  %v538_v30 = vunpack.c.h.bf16 %v536_v25  ;;  %v542_v62 = vunpack.c.h.bf16 %v543_v55  ;;  %v541_v63 = vunpack.c.l.bf16 %v543_v55  ;;  %v165_v23 = vld [vmem:[%s853_s4 + $0x8] sm:$0xff]  ;;  %v166_v25 = vld [vmem:[%s853_s4 + $0x10] sm:$0xff] }
   0xa   :  { %135 = vperm.xlu1 %651, %v124_v6  }
   0xb   :  { %130 = vperm.xlu0 %650, %v123_v7  }
   0xe   :  { %108 = vperm.xlu1 %651, %v89_v8  }
   0xf   :  { %103 = vperm.xlu0 %650, %v88_v9  }
  0x12   :  { %145 = vperm.xlu1 %651, %v126_v10  }
  0x13   :  { %140 = vperm.xlu0 %650, %v125_v11  }
  0x16   :  { %63 = vperm.xlu1 %651, %v45_v12  }
  0x17   :  { %58 = vperm.xlu0 %650, %v44_v13  }
  0x1a   :  { %187 = vperm.xlu1 %651, %v173_v14  }
  0x1b   :  { %182 = vperm.xlu0 %650, %v172_v15  }
  0x1e   :  { %197 = vperm.xlu1 %651, %v175_v16  }
  0x1f   :  { %192 = vperm.xlu0 %650, %v174_v17  }
  0x22   :  { %207 = vperm.xlu1 %651, %v177_v18  }
  0x23   :  { %202 = vperm.xlu0 %650, %v176_v19  }
  0x26   :  { %217 = vperm.xlu1 %651, %v179_v20  }
  0x27   :  { %212 = vperm.xlu0 %650, %v178_v21  }
  0x2b   :  { %510 = vperm.xlu0 %650, %v507_v22  }
  0x81   :  { %v94_v27 = vpop.permute.xlu1 %93 }
  0x82   :  { %v49_v28 = vpop.permute.xlu0 %48 }
  0x83   :  { %v66_v29 = vmul.f32 %v537_v26, %v49_v28  ;;  %v167_v26 = vld [vmem:[%s853_s4 + $0x18] sm:$0xff]  ;;  %v169_v28 = vld [vmem:[%s853_s4 + $0x28] sm:$0xff] }
  0x85   :  { %v70_v31 = vand.u32 2147483647, %v66_v29  ;;  %v99_v32 = vpop.permute.xlu1 %98 }
  0x86   :  { %v54_v33 = vpop.permute.xlu0 %53 }
  0x87   :  { %v72_v34 = vrot.slane %v70_v31, 1  ;;  %v67_v35 = vmul.f32 %v538_v30, %v54_v33  ;;  %v171_v30 = vld [vmem:[%s853_s4 + $0x38] sm:$0xff] }
  0x89   :  { %v74_v36 = vadd.f32 %v72_v34, %v70_v31  ;;  %v76_v37 = vand.u32 2147483647, %v67_v35  ;;  %v136_v40 = vpop.permute.xlu1 %135 }
  0x8a   :  { %v131_v41 = vpop.permute.xlu0 %130 }
  0x8b   :  { %v75_v38 = vadd.f32 1.0, %v74_v36  ;;  %v78_v39 = vrot.slane %v76_v37, 1 }
  0x8d   :  { %652 = vrcp.f32 %v75_v38  ;;  %v80_v42 = vadd.f32 %v78_v39, %v70_v31  ;;  %v109_v46 = vpop.permute.xlu1 %108  ;;  %v675_v31 = vmov 0.0  }
  0x8e   :  { %v104_v47 = vpop.permute.xlu0 %103  ;;  %606 = vmatprep.mubr.msk.f32.mxu1 %vm674_vm1, %v675_v31 }
  0x8f   :  { %v81_v44 = vadd.f32 1.0, %v80_v42 }
  0x91   :  { %654 = vrcp.f32 %v81_v44  ;;  %v146_v51 = vpop.permute.xlu1 %145 }
  0x92   :  { %v141_v52 = vpop.permute.xlu0 %140 }
  0x95   :  { %v64_v1 = vpop.permute.xlu1 %63 }
  0x96   :  { %v59_v2 = vpop.permute.xlu0 %58  ;;  %v69_v11 = vmul.f32 %v542_v62, %v64_v1 }
  0x97   :  { %v653_v49 = vpop.eup %652  ;;  %v68_v12 = vmul.f32 %v541_v63, %v59_v2 }
  0x98   :  { %v523_v50 = vadd.f32 -1.0, %v653_v49 }
  0x99   :  { %v188_v33 = vpop.permute.xlu1 %187 }
  0x9a   :  { %v114_v53 = vrot.slane %v523_v50, %v113_v48  ;;  %v183_v34 = vpop.permute.xlu0 %182 }
  0x9b   :  { %v655_v56 = vpop.eup %654 }
  0x9c   :  { %v116_v57 = vmul.f32 %v114_v53, %v99_v32  ;;  %v524_v58 = vadd.f32 -1.0, %v655_v56  ;;  %v115_v59 = vmul.f32 %v114_v53, %v94_v27  ;;  %v118_v60 = vmul.f32 %v114_v53, %v109_v46  ;;  %v168_v27 = vld [vmem:[%s853_s4 + $0x20] sm:$0xff] }
  0x9d   :  { %v117_v61 = vmul.f32 %v114_v53, %v104_v47  ;;  %v358_v32 = vld [vmem:[%s855_s7] sm:$0x1] }
  0x9e   :  { %v151_v0 = vrot.slane %v524_v58, %v150_v54  ;;  %v120_v3 = vadd.f32 1.0, %v116_v57  ;;  %v119_v4 = vadd.f32 1.0, %v115_v59  ;;  %v122_v5 = vadd.f32 1.0, %v118_v60  ;;  %v193_v37 = vpop.permute.xlu0 %192 }
  0x9f   :  { %v121_v6 = vadd.f32 1.0, %v117_v61 }
  0xa0   :  { %v153_v7 = vmul.f32 %v151_v0, %v136_v40  ;;  %v152_v8 = vmul.f32 %v151_v0, %v131_v41  ;;  %v155_v9 = vmul.f32 %v151_v0, %v146_v51  ;;  %v154_v10 = vmul.f32 %v151_v0, %v141_v52 }
  0xa2   :  { %v157_v13 = vadd.f32 %v153_v7, %v120_v3  ;;  %v156_v14 = vadd.f32 %v152_v8, %v119_v4  ;;  %v159_v15 = vadd.f32 %v155_v9, %v122_v5  ;;  %v158_v16 = vadd.f32 %v154_v10, %v121_v6  ;;  %v203_v47 = vpop.permute.xlu0 %202  ;;  %v359_v6 = vld [vmem:[%s856_s6] sm:$0x1] }
  0xa3   :  { %v515_v9 = vsub.s32 0, %v797_v45 }
  0xa4   :  { %v161_v17 = vmul.f32 %v157_v13, %v67_v35  ;;  %v160_v18 = vmul.f32 %v156_v14, %v66_v29  ;;  %v163_v19 = vmul.f32 %v159_v15, %v69_v11  ;;  %v162_v20 = vmul.f32 %v158_v16, %v68_v12  ;;  %v170_v29 = vld [vmem:[%s853_s4 + $0x30] sm:$0xff]  ;;  %v198_v35 = vpop.permute.xlu1 %197 }
  0xa6   :  { %v620_v21 = vpack.c.bf16 %v161_v17, %v160_v18  ;;  %v624_v22 = vpack.c.bf16 %v163_v19, %v162_v20  ;;  %v213_v55 = vpop.permute.xlu0 %212 }
  0xa8   :  { %621 = vmatprep.subr.bf16.mxu0 %v620_v21  ;;  %v208_v44 = vpop.permute.xlu1 %207 }
  0xa9   :  { %623 = vmatpush3.bf16.msra.mxu0 %v620_v21 }
  0xaa   :  { %625 = vmatprep.subr.bf16.mxu0 %v624_v22  ;;  %v511_v10 = vpop.permute.xlu0 %510 }
  0xab   :  { %v516_v12 = vrot.slane %v511_v10, %v515_v9 }
  0xac   :  { %v218_v52 = vpop.permute.xlu1 %217 }
  0xad   :  { %627 = vmatpush3.bf16.msra.mxu0 %v624_v22 }
  0xae   :  { %640 = vmatprep.subr.bf16.mxu0 %v673_v24 }
  0xb0   :  { %579 = vmatmul.mubr.msk.f32.vlgmr.msra.gmra.mrb[0].mxu0 %vm220_vm0, %v165_v23 }
  0xb1   :  { %642 = vmatpush3.bf16.msra.mxu0 %v620_v21  ;;  %581 = vmatprep.mubr.msk.f32.mxu0 %vm220_vm0, %v166_v25 }
  0xb2   :  { %643 = vmatprep.subr.bf16.mxu0 %v673_v24 }
  0xb4   :  { %582 = vmatmul.mubr.msk.f32.gmra.mrb[2].mxu0 %vm220_vm0, %v167_v26 }
  0xb5   :  { %645 = vmatpush3.bf16.msra.mxu0 %v624_v22  ;;  %584 = vmatprep.mubr.msk.f32.mxu0 %vm220_vm0, %v168_v27 }
  0xb8   :  { %585 = vmatmul.mubr.msk.f32.gmra.mrb[4].mxu0 %vm220_vm0, %v169_v28 }
  0xb9   :  { %587 = vmatprep.mubr.msk.f32.mxu0 %vm220_vm0, %v170_v29 }
  0xbc   :  { %588 = vmatmul.mubr.msk.f32.gmra.mrb[6].mxu0 %vm220_vm0, %v171_v30 }
  0xbd   :  { %617 = vmatprep.mubr.msk.f32.mxu0 %vm674_vm1, %v675_v31 }
  0xc0   :  { %618 = vmatmul.mubr.msk.f32.vlgmr.msra.gmra.mrb[8].mxu0 %vm220_vm0, %v358_v32 }
 0x183   :  { %v580_v36 = vpop.f32.mrb[0].mxu0 }
 0x184   :  { %v317_v38 = vadd.f32 %v580_v36, %v188_v33  ;;  %v311_v39 = vpop.f32.mrb[1].mxu0 }
 0x185   :  { %v312_v40 = vadd.f32 %v311_v39, %v183_v34 }
 0x186   :  { %656 = vtanh.f32 %v317_v38 }
 0x187   :  { %658 = vtanh.f32 %v312_v40  ;;  %v583_v41 = vpop.f32.mrb[2].mxu0 }
 0x188   :  { %v327_v42 = vadd.f32 %v583_v41, %v198_v35  ;;  %v321_v43 = vpop.f32.mrb[3].mxu0 }
 0x189   :  { %v322_v46 = vadd.f32 %v321_v43, %v193_v37 }
 0x18a   :  { %660 = vtanh.f32 %v327_v42 }
 0x18b   :  { %662 = vtanh.f32 %v322_v46  ;;  %v586_v48 = vpop.f32.mrb[4].mxu0 }
 0x18c   :  { %v337_v49 = vadd.f32 %v586_v48, %v208_v44  ;;  %v331_v50 = vpop.f32.mrb[5].mxu0 }
 0x18d   :  { %v332_v51 = vadd.f32 %v331_v50, %v203_v47 }
 0x18e   :  { %664 = vtanh.f32 %v337_v49 }
 0x18f   :  { %666 = vtanh.f32 %v332_v51  ;;  %v589_v53 = vpop.f32.mrb[6].mxu0 }
 0x190   :  { %v657_v54 = vpop.eup %656  ;;  %v347_v56 = vadd.f32 %v589_v53, %v218_v52  ;;  %v341_v57 = vpop.f32.mrb[7].mxu0 }
 0x191   :  { %v659_v58 = vpop.eup %658  ;;  %v342_v59 = vadd.f32 %v341_v57, %v213_v55 }
 0x192   :  { %668 = vtanh.f32 %v347_v56  ;;  %v629_v60 = vpack.c.bf16 %v657_v54, %v659_v58 }
 0x193   :  { %670 = vtanh.f32 %v342_v59  ;;  %v503_v7 = vpop.f32.mrb[8].mxu0 }
 0x194   :  { %v661_v61 = vpop.eup %660  ;;  %630 = vmatpush3.bf16.msra.mxu1 %v629_v60  ;;  %v619_v8 = vpop.f32.mrb[9].mxu0 }
 0x195   :  { %v663_v62 = vpop.eup %662  ;;  %631 = vmatprep.subr.bf16.mxu1 %v673_v24 }
 0x196   :  { %v632_v63 = vpack.c.bf16 %v661_v61, %v663_v62 }
 0x198   :  { %v665_v0 = vpop.eup %664  ;;  %633 = vmatpush3.bf16.msra.mxu1 %v632_v63 }
 0x199   :  { %v667_v1 = vpop.eup %666  ;;  %634 = vmatprep.subr.bf16.mxu1 %v673_v24 }
 0x19a   :  { %v635_v2 = vpack.c.bf16 %v665_v0, %v667_v1 }
 0x19c   :  { %v669_v3 = vpop.eup %668  ;;  %636 = vmatpush3.bf16.msra.mxu1 %v635_v2 }
 0x19d   :  { %v671_v4 = vpop.eup %670  ;;  %637 = vmatprep.subr.bf16.mxu1 %v673_v24 }
 0x19e   :  { %v638_v5 = vpack.c.bf16 %v669_v3, %v671_v4 }
 0x1a0   :  { %639 = vmatpush3.bf16.msra.mxu1 %v638_v5 }
 0x1a3   :  { %607 = vmatmul.mubr.msk.f32.vlgmr.msra.gmra.mrb[0].mxu1 %vm360_vm2, %v359_v6 }
 0x276   :  { %v430_v11 = vpop.f32.mrb[0].mxu1 }
 0x277   :  { %v504_v13 = vadd.f32 %v503_v7, %v430_v11  ;;  %v608_v14 = vpop.f32.mrb[1].mxu1 }
 0x279   :  { %v517_v15 = vadd.f32 %v516_v12, %v504_v13 }
 0x27b   :  { %518 = vst [vmem:[%s857_s9] sm:$0x1] %v517_v15 }

</bundles_post_ra>
